<compile_context>
chip_gen: v7x
topology: tpu7x:2x2x1
jax: 0.10.0
libtpu: 0.0.40
codegen_flags: <defaults>
</compile_context>

<pallas_src>
import functools

import jax
import jax.numpy as jnp
from jax.experimental import pallas as pl
from jax.experimental.pallas import tpu as pltpu


def _rmsnorm_kernel(x_ref, w_ref, o_ref, *, eps):
    # x_ref: (ROW_TILE, H) input tile, w_ref: (1, H) weight, o_ref: (ROW_TILE, H).
    x = x_ref[...].astype(jnp.float32)
    rms = jnp.sqrt(jnp.mean(x * x, axis=-1, keepdims=True))   # (T, 1) f32
    # One exact divide per row (cheap) instead of a full-tile divide, then a
    # broadcasted VPU multiply.  Numerically identical to x / (rms + eps).
    inv = 1.0 / (rms + eps)                                   # (T, 1) f32
    y = w_ref[...].astype(jnp.float32) * (x * inv)            # f32, as in the spec
    o_ref[...] = y.astype(o_ref.dtype)


_VMEM_LIMIT_BYTES = 48 * 1024 * 1024    # fits v7x's 64 MiB VMEM, lifts v5e/v6e defaults
_TILE_BUDGET_BYTES = 36 * 1024 * 1024   # budget for pipeline buffers when sizing tiles


def _round_up(x, m):
    return ((x + m - 1) // m) * m


def _pick_row_tile(n_rows, hidden, in_itemsize):
    # Per-row VMEM cost: double-buffered input + output tiles (2x each) plus
    # roughly 3 f32-sized temporaries inside the kernel body.
    bytes_per_row = hidden * (4 * in_itemsize + 3 * 4)
    tile = _TILE_BUDGET_BYTES // max(bytes_per_row, 1)
    tile = max(8, min(1024, (tile // 8) * 8))
    if n_rows > 8:
        # Keep at least 2 grid steps so the "parallel" row axis can shard
        # across both TensorCores on v7x / megacore parts.
        tile = min(tile, max(8, _round_up(pl.cdiv(n_rows, 2), 8)))
    # No point tiling wider than the (8-rounded) row count.
    tile = min(tile, _round_up(n_rows, 8))
    return tile


def deepseek_v2_rmsnorm(hidden_states, weight, eps=1e-6, row_tile=None):
    """hidden_states: (..., H), weight: (H,). Returns same shape and dtype."""
    orig_shape = hidden_states.shape
    orig_dtype = hidden_states.dtype
    H = orig_shape[-1]
    x2d = hidden_states.reshape(-1, H)
    R = x2d.shape[0]

    if row_tile is None:
        row_tile = _pick_row_tile(R, H, jnp.dtype(orig_dtype).itemsize)

    w2d = weight.reshape(1, H)
    grid = (pl.cdiv(R, row_tile),)   # ragged last block handled by Pallas (no padding copy)

    out = pl.pallas_call(
        functools.partial(_rmsnorm_kernel, eps=float(eps)),
        out_shape=jax.ShapeDtypeStruct((R, H), orig_dtype),
        grid_spec=pltpu.PrefetchScalarGridSpec(
            num_scalar_prefetch=0,
            grid=grid,
            in_specs=[
                pl.BlockSpec((row_tile, H), lambda i: (i, 0)),
                pl.BlockSpec((1, H), lambda i: (0, 0)),
            ],
            out_specs=pl.BlockSpec((row_tile, H), lambda i: (i, 0)),
        ),
        compiler_params=pltpu.CompilerParams(
            dimension_semantics=("parallel",),
            vmem_limit_bytes=_VMEM_LIMIT_BYTES,
        ),
    )(x2d, w2d)

    return out.reshape(orig_shape)


def _reference(x, weight, eps):
    xf = x.astype(jnp.float32)
    rms = jnp.sqrt(jnp.mean(xf * xf, axis=-1, keepdims=True))
    return (weight.astype(jnp.float32) * (xf / (rms + eps))).astype(x.dtype)


if __name__ == "__main__":
    key = jax.random.PRNGKey(0)

    # Case 1: small, tile-divisible rows (batch=2, seq=8, hidden=32).
    batch, seq, hidden = 2, 8, 32
    x = jax.random.normal(key, (batch, seq, hidden), dtype=jnp.float32)
    weight = jnp.ones((hidden,), dtype=jnp.float32)  # module init: ones(hidden_dim)

    y = deepseek_v2_rmsnorm(x, weight, eps=1e-6)
    jax.block_until_ready(y)
    ref = _reference(x, weight, 1e-6)
    assert y.shape == x.shape and y.dtype == x.dtype
    assert jnp.allclose(y, ref, atol=1e-5, rtol=1e-5), "mismatch vs reference (case 1)"

    # Case 2: ragged row count (batch=3, seq=5 -> 15 rows, not a multiple of 8),
    # exercising the no-padding / ragged-last-block path.
    x2 = jax.random.normal(jax.random.PRNGKey(1), (3, 5, hidden), dtype=jnp.float32)
    y2 = deepseek_v2_rmsnorm(x2, weight, eps=1e-6)
    jax.block_until_ready(y2)
    ref2 = _reference(x2, weight, 1e-6)
    assert jnp.allclose(y2, ref2, atol=1e-5, rtol=1e-5), "mismatch vs reference (case 2)"

    print("KERNEL_OK")
</pallas_src>

<mosaic_0001>
module attributes {stable_mosaic.version = 11 : i64} {
  func.func @_rmsnorm_kernel(%arg0: i32, %arg1: memref<8x32xf32, #tpu.memory_space<vmem>>, %arg2: memref<1x32xf32, #tpu.memory_space<vmem>>, %arg3: memref<8x32xf32, #tpu.memory_space<vmem>>) attributes {dimension_semantics = [#tpu.dimension_semantics<parallel>], iteration_bounds = array<i64: 2>, scalar_prefetch = 0 : i64, scratch_operands = 0 : i64, tpu.core_type = #tpu.core_type<tc>, window_params = [{transform_indices = @transform_0, window_bounds = array<i64: 8, 32>}, {pipeline_mode = #tpu.pipeline_mode<synchronous>, transform_indices = @transform_1, window_bounds = array<i64: 1, 32>}, {transform_indices = @transform_2, window_bounds = array<i64: 8, 32>}]} {
    %c0 = arith.constant 0 : index
    %c0_0 = arith.constant 0 : index
    %0 = vector.load %arg1[%c0, %c0_0] : memref<8x32xf32, #tpu.memory_space<vmem>>, vector<8x32xf32>
    %1 = arith.mulf %0, %0 : vector<8x32xf32>
    %cst = arith.constant dense<0.000000e+00> : vector<8xf32>
    %2 = vector.multi_reduction <add>, %1, %cst [1] : vector<8x32xf32> to vector<8xf32>
    %3 = vector.shape_cast %2 : vector<8xf32> to vector<8x1xf32>
    %cst_1 = arith.constant 3.200000e+01 : f32
    %4 = vector.broadcast %cst_1 : f32 to vector<8x1xf32>
    %5 = arith.divf %3, %4 : vector<8x1xf32>
    %6 = math.sqrt %5 : vector<8x1xf32>
    %cst_2 = arith.constant 9.99999997E-7 : f32
    %7 = vector.broadcast %cst_2 : f32 to vector<8x1xf32>
    %8 = arith.addf %6, %7 : vector<8x1xf32>
    %cst_3 = arith.constant 1.000000e+00 : f32
    %9 = vector.broadcast %cst_3 : f32 to vector<8x1xf32>
    %10 = arith.divf %9, %8 : vector<8x1xf32>
    %c0_4 = arith.constant 0 : index
    %c0_5 = arith.constant 0 : index
    %11 = vector.load %arg2[%c0_4, %c0_5] : memref<1x32xf32, #tpu.memory_space<vmem>>, vector<1x32xf32>
    %12 = vector.broadcast %10 : vector<8x1xf32> to vector<8x32xf32>
    %13 = arith.mulf %0, %12 : vector<8x32xf32>
    %14 = vector.broadcast %11 : vector<1x32xf32> to vector<8x32xf32>
    %15 = arith.mulf %14, %13 : vector<8x32xf32>
    %c0_6 = arith.constant 0 : index
    %c0_7 = arith.constant 0 : index
    %16 = vector.load %arg3[%c0_6, %c0_7] : memref<8x32xf32, #tpu.memory_space<vmem>>, vector<8x32xf32>
    tpu.vector_store %arg3[%c0_6, %c0_7], %15 {strides = array<i32>} : memref<8x32xf32, #tpu.memory_space<vmem>>, vector<8x32xf32>,
    return
  }
  func.func @transform_0(%arg0: i32) -> (i32, i32) {
    %c0_i32 = arith.constant 0 : i32
    %c0_i32_0 = arith.constant 0 : i32
    return %arg0, %c0_i32 : i32, i32
  }
  func.func @transform_1(%arg0: i32) -> (i32, i32) {
    %c0_i32 = arith.constant 0 : i32
    %c0_i32_0 = arith.constant 0 : i32
    %c0_i32_1 = arith.constant 0 : i32
    return %c0_i32, %c0_i32_0 : i32, i32
  }
  func.func @transform_2(%arg0: i32) -> (i32, i32) {
    %c0_i32 = arith.constant 0 : i32
    %c0_i32_0 = arith.constant 0 : i32
    return %arg0, %c0_i32 : i32, i32
  }
}

</mosaic_0001>

<bundles_post_ra>
// kernel: tpu_custom_call.1
= control target key start
LH: loop header
LB: loop body
LE: loop exit
PB: predicated region body
PF: predicated region fallthrough
CT: control target
= control target key end

     0   :  { %7 = vsyncpa [#allocation3], 0  ;;  %s615_s0 = inlined_call_operand.hbm [shape: f32[16,32], index: 0, kind: input, shape index: {}]   ;;  %s616_s1 = inlined_call_operand.vmem [shape: f32[1,32], index: 1, kind: input, shape index: {}]   ;;  %s617_s2 = inlined_call_operand.hbm [shape: f32[16,32], index: 2, kind: output, shape index: {}]  }
   0x1   :  { %9 = vsyncpa [#allocation3 + $0x1], 0 }
   0x2   :  { %10 = vsyncpa [#allocation4], 0 }
   0x3   :  { %12 = vsyncpa [#allocation4 + $0x1], 0  ;;  %s449_s9 = smov 0   ;;  %s451_s10 = smov 0  }
   0x4   :  { %s453_s11 = smov 0   ;;  %s455_s12 = smov 0  }
   0x5 LB: > { %s470_s13 = sadd.s32 4294967295, %s430_s12   ;;  %s271_s14 = sadd.s32 4294967294, %s430_s12   ;;  %s430_s12 = sphi %s455_s12, %s632_s12   ;;  %s426_s11 = sphi %s453_s11, %s631_s11   ;;  %s422_s10 = sphi %s451_s10, %s630_s10   ;;  %s418_s9 = sphi %s449_s9, %s629_s9  }
   0x6   : > { %s474_s15 = sadd.s32 1, %s430_s12   ;;  %s25_s16 = sadd.s32 1, %s426_s11 }
   0x7   : > { %s22_s17 = ssub.s32 %s430_s12, %s474_s15  ;;  %p32_p0 = scmp.ne.s32.totalorder %s426_s11, %s422_s10 }
   0x8   : > { %p23_p1 = scmp.eq.s32.totalorder %s22_s17, 0  ;;  %p33_p2 = scmp.eq.s32.totalorder %s430_s12, 0 }
   0x9   : > { %p38_p3 = scmp.ne.s32.totalorder %s422_s10, %s418_s9  ;;  %p39_p4 = scmp.eq.s32.totalorder %s470_s13, 0 }
   0xa   : > { %s486_s18 = scalar_select %p23_p1, %s426_s11, %s25_s16  }
   0xb   : > { %p488_p5 = por %p33_p2, %p32_p0  ;;  %p492_p6 = por %p39_p4, %p38_p3 }
   0xc   : > { %p83_p7 = scmp.eq.s32.totalorder %s470_s13, 1  ;;  %p89_p8 = scmp.eq.s32.totalorder %s271_s14, 1 }
   0xd   : > { %p296_p10 = scmp.lt.s32.totalorder %s430_s12, 2  ;;  %s112_s23 = sand.u32 1, %s426_s11  }
   0xe   : > { %p499_p11 = por %p83_p7, %p32_p0  ;;  %p503_p12 = por %p89_p8, %p38_p3 }
   0xf   : > { %s275_s24 = sshll.u32 %s430_s12, 7  ;;  %s274_s25 = sshll.u32 %s112_s23, 3 }
  0x10   : > { %s621_s21 = scalar_select %p499_p11, 1, 0 }
  0x11   : > { %s622_s22 = scalar_select %p503_p12, 1, 0 }
  0x12   : > { %s512_s28 = scalar_lea.hbm %s615_s0, %s275_s24  ;;  %s116_s29 = scalar_lea.vmem [#allocation2], %s274_s25 }
  0x13   : > { %s123_s30 = sshll.u32 %s116_s29, 4  ;;  %p516_p13 = pnand %p296_p10, %p488_p5  ;;  %s520_s30 = int_to_ptr.vmem [resolvable:$true] %s123_s30 }
  0x14   : > { %s113_s4 = scalar_lea.sflag [#allocation3], %s112_s23  ;;  %s334_s5 = scalar_lea.hbm %s512_s28, 128 }
  0x15   : > { %p335_p2 = scmp.ne.s32.totalorder %s512_s28, %s334_s5  ;;  %p336_p3 = pneg %p516_p13 }
  0x16   : > { %s339_s8 = scalar_lea.hbm %s615_s0, 256  ;;  %p340_p5 = scmp.lt.u32.totalorder %s512_s28, %s615_s0 }
  0x17   : > { %p337_p4 = pnand %p336_p3, %p335_p2  ;;  %p341_p8 = scmp.lt.u32.totalorder %s339_s8, %s334_s5 }
  0x18   : > { %p343_p9 = scmp.lt.u32.totalorder %s334_s5, %s512_s28 }
  0x19   : > { %p338_p7 = pneg %p337_p4  ;;  %p342_p10 = por %p341_p8, %p340_p5 }
  0x1b   : > { %p344_p0 = por %p343_p9, %p342_p10 }
  0x1d   : > { %p345_p1 = pnand %p344_p0, %p338_p7 }
  0x1f   : > { %348 = shalt.err (!%p345_p1)
}
  0x20   : > { %s349_s17 = scalar_lea.vmem %s520_s30, 128  ;;  %s432_s19 = smov [#allocation2]  }
  0x21   : > { %p350_p2 = scmp.ne.s32.totalorder %s520_s30, %s349_s17  ;;  %s354_s23 = sshll.u32 %s432_s19, 4  ;;  %s355_s23 = int_to_ptr.vmem [resolvable:$false] %s354_s23 }
  0x22   : > { %s356_s24 = scalar_lea.vmem %s355_s23, 256  ;;  %p357_p11 = scmp.lt.s32.totalorder %s520_s30, %s355_s23 }
  0x23   : > { %p352_p4 = pnand %p350_p2, %p336_p3  ;;  %p358_p5 = scmp.lt.s32.totalorder %s356_s24, %s349_s17 }
  0x25   : > { %p353_p12 = pneg %p352_p4  ;;  %p359_p8 = por %p358_p5, %p357_p11 }
  0x27   : > { %p360_p9 = pnand %p359_p8, %p353_p12 }
  0x29   : > { %363 = shalt.err (!%p360_p9)
}
  0x2a   : > { %291 = dma.hbm_to_vmem [thread:$0]  (!%p516_p13), %s512_s28, 128, %s520_s30, %s113_s4  }
  0x2b   : > { %p624_p0 = scmp.lt.s32.totalorder %s430_s12, 3  ;;  %p625_p1 = scmp.ge.s32.totalorder %s430_s12, 1 }
  0x2d   : > { %p129_p3 = pnand %p625_p1, %p624_p0 }
  0x2e   : > { %s554_s25 = sand.u32 (!%p129_p3), 1, %s422_s10  }
  0x2f   : > { %132 = sbr.rel (%p129_p3) target bundleno = 249 (0xf9), region = 28  ;;  %s277_s26 = sshll.u32 (!%p129_p3), %s554_s25, 3 }
  0x30   : > { %s135_s27 = scalar_lea.sflag (!%p129_p3), [#allocation3], %s554_s25  ;;  %s138_s29 = scalar_lea.vmem (!%p129_p3), [#allocation2], %s277_s26 }
  0x36   : > { %409 = dma.done.wait (%p492_p6), %s135_s27, 128  }
  0x37   : > { %411 = vsyncadd (%p492_p6), %s135_s27, 4294967168  ;;  %v159_v0 = vld [vmem:[%s138_s29] sm:$0xff]  ;;  %vm161_vm0 = vcmask 261120   ;;  %s281_s30 = sshll.u32 %s470_s13, 7  ;;  %s158_s3 = scalar_lea.vmem [#allocation5], %s277_s26 }
  0x38   : > { %v160_v1 = vmul.f32 %v159_v0, %v159_v0  ;;  %v279_v12 = vld [vmem:[%s616_s1] ss:$0 sm:$0xff]  ;;  %s201_s4 = sshll.u32 %s158_s3, 4  ;;  %s570_s7 = scalar_lea.hbm %s617_s2, %s281_s30  ;;  %s572_s4 = int_to_ptr.vmem [resolvable:$true] %s201_s4 }
  0x39   : > { %s188_s8 = scalar_lea.sflag [#allocation4], %s554_s25  ;;  %s364_s14 = scalar_lea.vmem %s572_s4, 128 }
  0x3a   : > { %v162_v2 = vsel %vm161_vm0, %v160_v1, 0.0  ;;  %p365_p6 = scmp.ne.s32.totalorder %s572_s4, %s364_s14  ;;  %p626_p11 = scmp.ne.s32.totalorder %s621_s21, 0 }
  0x3b   : > { %163 = vadd.xlane.f32.xlu0 %v162_v2  ;;  %s433_s13 = smov [#allocation5]  }
  0x3c   : > { %p366_p12 = pnand %p365_p6, %p626_p11  ;;  %s368_s16 = sshll.u32 %s433_s13, 4  ;;  %s369_s16 = int_to_ptr.vmem [resolvable:$false] %s368_s16 }
  0x3d   : > { %s370_s17 = scalar_lea.vmem %s369_s16, 256  ;;  %p371_p7 = scmp.lt.s32.totalorder %s572_s4, %s369_s16 }
  0x3e   : > { %p367_p13 = pneg %p366_p12  ;;  %p372_p10 = scmp.lt.s32.totalorder %s370_s17, %s364_s14 }
  0x40   : > { %p373_p2 = por %p372_p10, %p371_p7 }
  0x42   : > { %p374_p4 = pnand %p373_p2, %p367_p13 }
  0xc8   : > { %v164_v3 = vpop.xlane.xlu0 %163 }
  0xc9   : > { %v166_v4 = vmul.f32 0.03125, %v164_v3 }
  0xcb   : > { %330 = vrsqrt.f32 %v166_v4  ;;  %vm169_vm1 = vcmp.eq.f32.partialorder %v166_v4, inf  ;;  %v172_v7 = vand.u32 2147483648, %v166_v4  ;;  %vm171_vm2 = vcmp.eq.f32.partialorder %v166_v4, 0.0 }
  0xd5   : > { %v331_v5 = vpop.eup %330 }
  0xd6   : > { %v168_v6 = vmul.f32 %v331_v5, %v166_v4 }
  0xd8   : > { %v170_v8 = vsel %vm169_vm1, %v166_v4, %v168_v6 }
  0xd9   : > { %v173_v9 = vsel %vm171_vm2, %v172_v7, %v170_v8 }
  0xda   : > { %v174_v10 = vadd.f32 1e-06, %v173_v9 }
  0xdc   : > { %332 = vrcp.f32 %v174_v10 }
  0xe6   : > { %v333_v11 = vpop.eup %332 }
  0xe7   : > { %v178_v13 = vmul.f32 %v333_v11, %v159_v0 }
  0xe9   : > { %v185_v14 = vmul.f32 %v279_v12, %v178_v13 }
  0xeb   : > { %186 = vst.msk [vmem:[%s158_s3] sm:$0xff] %vm161_vm0, %v185_v14 }
  0xec   : > { %377 = shalt.err (!%p374_p4)
}
  0xed   : > { %s378_s19 = scalar_lea.hbm %s570_s7, 128  ;;  %s382_s25 = scalar_lea.hbm %s617_s2, 256 }
  0xee   : > { %p379_p5 = scmp.ne.s32.totalorder %s570_s7, %s378_s19  ;;  %p383_p0 = scmp.lt.u32.totalorder %s570_s7, %s617_s2 }
  0xef   : > { %p384_p1 = scmp.lt.u32.totalorder %s382_s25, %s378_s19  ;;  %p386_p6 = scmp.lt.u32.totalorder %s378_s19, %s570_s7 }
  0xf0   : > { %p380_p8 = pnand %p379_p5, %p626_p11 }
  0xf1   : > { %p385_p3 = por %p384_p1, %p383_p0 }
  0xf2   : > { %p381_p9 = pneg %p380_p8 }
  0xf3   : > { %p387_p12 = por %p386_p6, %p385_p3 }
  0xf5   : > { %p388_p13 = pnand %p387_p12, %p381_p9 }
  0xf7   : > { %391 = shalt.err (!%p388_p13)
}
  0xf8   : > { %286 = dma.vmem_to_hbm [thread:$0]  (%p626_p11), %s572_s4, 128, %s570_s7, %s188_s8  }
  0xf9 PF: > { %s213_s29 = sand.u32 1, %s418_s9   ;;  %p627_p7 = scmp.ne.s32.totalorder %s622_s22, 0 }
  0xfa   : > { %p628_p10 = scmp.ge.s32.totalorder %s430_s12, 2  ;;  %s214_s20 = scalar_lea.sflag [#allocation4], %s213_s29 }
  0xfc   : > { %p293_p2 = pnand %p628_p10, %p627_p7 }
  0xfe   : > { %413 = dma.done.wait (!%p293_p2), %s214_s20, 128  }
  0xff   : > { %415 = vsyncadd (!%p293_p2), %s214_s20, 4294967168  ;;  %p15_p4 = scmp.ge.s32.totalorder %s474_s15, 4   ;;  %s629_s9 = smov %s422_s10 }
 0x100   : > { %s630_s10 = smov %s426_s11  ;;  %s631_s11 = smov %s486_s18 }
 0x101   : > { %s632_s12 = smov %s474_s15  ;;  %17 = sbr.rel (!%p15_p4) target bundleno = 5 (0x5), region = 73 }
 0x108   :  { %219 = vsyncpa [#allocation3], 1 }
 0x109   :  { %221 = vsyncpa [#allocation3 + $0x1], 1 }
 0x10a   :  { %222 = vsyncpa [#allocation4], 1 }
 0x10b   :  { %224 = vsyncpa [#allocation4 + $0x1], 1 }

</bundles_post_ra>
